<compile_context>
chip_gen: v7x
topology: tpu7x:2x2x1
jax: 0.10.0
libtpu: 0.0.40
codegen_flags: <defaults>
</compile_context>

<pallas_src>
import functools

import jax
import jax.numpy as jnp
from jax.experimental import pallas as pl
from jax.experimental.pallas import tpu as pltpu


def _round_up(x, m):
    return ((x + m - 1) // m) * m


def _kd_loss_kernel(fs_ref, ft_ref, out_ref, tt_ref, ts_ref, ss_ref):
    m = pl.program_id(1)

    @pl.when(m == 0)
    def _init():
        tt_ref[...] = jnp.zeros_like(tt_ref)
        ts_ref[...] = jnp.zeros_like(ts_ref)
        ss_ref[...] = jnp.zeros_like(ss_ref)

    # Feed bf16 into the MXU when the inputs are bf16 (2x MXU throughput on
    # v6e/v7x); norm math always in f32.
    mxu_dtype = jnp.bfloat16 if fs_ref.dtype == jnp.bfloat16 else jnp.float32

    def normalize(f):
        f32 = f.astype(jnp.float32)                                   # (C_pad, TM)
        # L2() of the reference: sqrt(sum_c f^2) + 1e-8 per spatial position.
        norm = jnp.sqrt(jnp.sum(f32 * f32, axis=0, keepdims=True)) + jnp.float32(1e-8)
        inv = pl.reciprocal(norm)          # exact reciprocal on the EUP; frees VALU slots
        return (f32 * inv).astype(mxu_dtype)

    fsn = normalize(fs_ref[0])             # (C_pad, TM)
    ftn = normalize(ft_ref[0])             # (C_pad, TM)

    # Contract over the spatial tile (axis 1) -> (C_pad, C_pad) on the MXU.
    contract = (((1,), (1,)), ((), ()))
    tt_ref[...] += jax.lax.dot_general(ftn, ftn, contract,
                                       preferred_element_type=jnp.float32)
    ts_ref[...] += jax.lax.dot_general(ftn, fsn, contract,
                                       preferred_element_type=jnp.float32)
    ss_ref[...] += jax.lax.dot_general(fsn, fsn, contract,
                                       preferred_element_type=jnp.float32)

    @pl.when(m == pl.num_programs(1) - 1)
    def _finalize():
        tt = tt_ref[...]
        ts = ts_ref[...]
        ss = ss_ref[...]
        # Frobenius combination, element-wise; final scalar reduce in wrapper.
        out_ref[0] = tt * tt - 2.0 * ts * ts + ss * ss


def kd_loss(f_s, f_t, *, tile_m=512):
    """Pallas implementation of sim_dis_compute(f_S, f_T)."""
    B, C, H, W = f_s.shape
    assert f_t.shape == f_s.shape
    M = H * W

    fs = f_s.reshape(B, C, M)
    ft = f_t.reshape(B, C, M)

    # Pad C to a sublane multiple and M to a lane-aligned tile multiple.
    # Zero channels / zero spatial positions contribute nothing (0 / (0+1e-8) = 0),
    # so padding is exact.
    C_pad = max(8, _round_up(C, 8))
    tile_m = min(tile_m, _round_up(M, 128))
    M_pad = _round_up(M, tile_m)
    if (C_pad, M_pad) != (C, M):
        pad = ((0, 0), (0, C_pad - C), (0, M_pad - M))
        fs = jnp.pad(fs, pad)
        ft = jnp.pad(ft, pad)
    num_m = M_pad // tile_m

    # VMEM footprint is tiny now (2 inputs x 2 buffers x C_pad*tile_m*itemsize
    # plus 3 x C_pad^2 f32 scratch), well inside default scoped VMEM on
    # v5e/v6e/v7x, so no explicit vmem_limit_bytes is needed.
    per_batch = pl.pallas_call(
        _kd_loss_kernel,
        out_shape=jax.ShapeDtypeStruct((B, C_pad, C_pad), jnp.float32),
        grid_spec=pltpu.PrefetchScalarGridSpec(
            num_scalar_prefetch=0,
            grid=(B, num_m),
            in_specs=[
                pl.BlockSpec((1, C_pad, tile_m), lambda b, m: (b, 0, m)),
                pl.BlockSpec((1, C_pad, tile_m), lambda b, m: (b, 0, m)),
            ],
            out_specs=pl.BlockSpec((1, C_pad, C_pad), lambda b, m: (b, 0, 0)),
            scratch_shapes=[
                pltpu.VMEM((C_pad, C_pad), jnp.float32),
                pltpu.VMEM((C_pad, C_pad), jnp.float32),
                pltpu.VMEM((C_pad, C_pad), jnp.float32),
            ],
        ),
        compiler_params=pltpu.CompilerParams(
            # batch axis can shard across v7x's two TensorCores;
            # spatial-tile axis is a reduction (accumulators persist across it).
            dimension_semantics=("parallel", "arbitrary"),
        ),
    )(fs, ft)

    total = jnp.sum(per_batch)
    # sim_err = (sim_T - sim_S)^2 / (W*H)^2 / B, summed.
    denom = float(M) * float(M) * float(B)
    return total / jnp.float32(denom)


def _kd_loss_ref(f_s, f_t):
    """Pure-JAX reference of the PyTorch module, for a sanity check."""
    def similarity(feat):
        feat = feat.astype(jnp.float32)
        norm = jnp.sqrt(jnp.sum(feat ** 2, axis=1, keepdims=True)) + 1e-8
        feat = feat / norm
        B, C, H, W = feat.shape
        feat = feat.reshape(B, C, H * W)
        return jnp.einsum('icm,icn->imn', feat, feat)

    sim_err = (similarity(f_t) - similarity(f_s)) ** 2
    sim_err = sim_err / (f_t.shape[-1] * f_t.shape[-2]) ** 2 / f_t.shape[0]
    return jnp.sum(sim_err)


if __name__ == "__main__":
    key = jax.random.PRNGKey(0)
    k_s, k_t = jax.random.split(key)

    B, C, H, W = 2, 4, 16, 16
    f_s = jax.random.normal(k_s, (B, C, H, W), dtype=jnp.float32)
    f_t = jax.random.normal(k_t, (B, C, H, W), dtype=jnp.float32)

    loss = jax.block_until_ready(jax.jit(functools.partial(kd_loss))(f_s, f_t))
    loss_ref = jax.block_until_ready(_kd_loss_ref(f_s, f_t))

    # Trace-identity restructure changes summation order -> allow slightly
    # looser tolerance than exact bit-match.
    assert jnp.allclose(loss, loss_ref, rtol=1e-4, atol=1e-6), (loss, loss_ref)
    print("KERNEL_OK")
</pallas_src>

<mosaic_0001>
module attributes {stable_mosaic.version = 11 : i64} {
  func.func @_kd_loss_kernel(%arg0: i32, %arg1: i32, %arg2: memref<1x8x256xf32, #tpu.memory_space<vmem>>, %arg3: memref<1x8x256xf32, #tpu.memory_space<vmem>>, %arg4: memref<1x8x8xf32, #tpu.memory_space<vmem>>, %arg5: memref<8x8xf32, #tpu.memory_space<vmem>>, %arg6: memref<8x8xf32, #tpu.memory_space<vmem>>, %arg7: memref<8x8xf32, #tpu.memory_space<vmem>>) attributes {dimension_semantics = [#tpu.dimension_semantics<parallel>, #tpu.dimension_semantics<arbitrary>], iteration_bounds = array<i64: 2, 1>, scalar_prefetch = 0 : i64, scratch_operands = 3 : i64, tpu.core_type = #tpu.core_type<tc>, window_params = [{transform_indices = @transform_0, window_bounds = array<i64: 1, 8, 256>}, {transform_indices = @transform_1, window_bounds = array<i64: 1, 8, 256>}, {transform_indices = @transform_2, window_bounds = array<i64: 1, 8, 8>}]} {
    %c0_i32 = arith.constant 0 : i32
    %0 = arith.cmpi eq, %arg1, %c0_i32 : i32
    %1 = arith.extui %0 : i1 to i32
    %c0_i32_0 = arith.constant 0 : i32
    %2 = arith.cmpi ne, %1, %c0_i32_0 : i32
    scf.if %2 {
      %cst_26 = arith.constant 0.000000e+00 : f32
      %40 = vector.broadcast %cst_26 : f32 to vector<8x8xf32>
      %c0_27 = arith.constant 0 : index
      %c0_28 = arith.constant 0 : index
      %41 = vector.load %arg5[%c0_27, %c0_28] : memref<8x8xf32, #tpu.memory_space<vmem>>, vector<8x8xf32>
      tpu.vector_store %arg5[%c0_27, %c0_28], %40 {strides = array<i32>} : memref<8x8xf32, #tpu.memory_space<vmem>>, vector<8x8xf32>,
      %cst_29 = arith.constant 0.000000e+00 : f32
      %42 = vector.broadcast %cst_29 : f32 to vector<8x8xf32>
      %c0_30 = arith.constant 0 : index
      %c0_31 = arith.constant 0 : index
      %43 = vector.load %arg6[%c0_30, %c0_31] : memref<8x8xf32, #tpu.memory_space<vmem>>, vector<8x8xf32>
      tpu.vector_store %arg6[%c0_30, %c0_31], %42 {strides = array<i32>} : memref<8x8xf32, #tpu.memory_space<vmem>>, vector<8x8xf32>,
      %cst_32 = arith.constant 0.000000e+00 : f32
      %44 = vector.broadcast %cst_32 : f32 to vector<8x8xf32>
      %c0_33 = arith.constant 0 : index
      %c0_34 = arith.constant 0 : index
      %45 = vector.load %arg7[%c0_33, %c0_34] : memref<8x8xf32, #tpu.memory_space<vmem>>, vector<8x8xf32>
      tpu.vector_store %arg7[%c0_33, %c0_34], %44 {strides = array<i32>} : memref<8x8xf32, #tpu.memory_space<vmem>>, vector<8x8xf32>,
    } else {
    }
    %c0 = arith.constant 0 : index
    %c0_1 = arith.constant 0 : index
    %c0_2 = arith.constant 0 : index
    %3 = vector.load %arg2[%c0, %c0_1, %c0_2] : memref<1x8x256xf32, #tpu.memory_space<vmem>>, vector<1x8x256xf32>
    %4 = vector.shape_cast %3 : vector<1x8x256xf32> to vector<8x256xf32>
    %5 = arith.mulf %4, %4 : vector<8x256xf32>
    %cst = arith.constant dense<0.000000e+00> : vector<256xf32>
    %6 = vector.multi_reduction <add>, %5, %cst [0] : vector<8x256xf32> to vector<256xf32>
    %7 = vector.shape_cast %6 : vector<256xf32> to vector<1x256xf32>
    %8 = math.sqrt %7 : vector<1x256xf32>
    %cst_3 = arith.constant 9.99999993E-9 : f32
    %9 = vector.broadcast %cst_3 : f32 to vector<1x256xf32>
    %10 = arith.addf %8, %9 : vector<1x256xf32>
    %11 = tpu.reciprocal %10 : vector<1x256xf32> -> vector<1x256xf32>
    %12 = vector.broadcast %11 : vector<1x256xf32> to vector<8x256xf32>
    %13 = arith.mulf %4, %12 : vector<8x256xf32>
    %c0_4 = arith.constant 0 : index
    %c0_5 = arith.constant 0 : index
    %c0_6 = arith.constant 0 : index
    %14 = vector.load %arg3[%c0_4, %c0_5, %c0_6] : memref<1x8x256xf32, #tpu.memory_space<vmem>>, vector<1x8x256xf32>
    %15 = vector.shape_cast %14 : vector<1x8x256xf32> to vector<8x256xf32>
    %16 = arith.mulf %15, %15 : vector<8x256xf32>
    %cst_7 = arith.constant dense<0.000000e+00> : vector<256xf32>
    %17 = vector.multi_reduction <add>, %16, %cst_7 [0] : vector<8x256xf32> to vector<256xf32>
    %18 = vector.shape_cast %17 : vector<256xf32> to vector<1x256xf32>
    %19 = math.sqrt %18 : vector<1x256xf32>
    %cst_8 = arith.constant 9.99999993E-9 : f32
    %20 = vector.broadcast %cst_8 : f32 to vector<1x256xf32>
    %21 = arith.addf %19, %20 : vector<1x256xf32>
    %22 = tpu.reciprocal %21 : vector<1x256xf32> -> vector<1x256xf32>
    %23 = vector.broadcast %22 : vector<1x256xf32> to vector<8x256xf32>
    %24 = arith.mulf %15, %23 : vector<8x256xf32>
    %c0_9 = arith.constant 0 : index
    %c0_10 = arith.constant 0 : index
    %25 = vector.load %arg5[%c0_9, %c0_10] : memref<8x8xf32, #tpu.memory_space<vmem>>, vector<8x8xf32>
    %cst_11 = arith.constant dense<0.000000e+00> : vector<8x8xf32>
    %26 = tpu.matmul %24, %24, %cst_11 {dimension_numbers = #tpu.dot_dimension_numbers<[1], [1], [0], [0], [0, 0, 1, 0], [], []>} : vector<8x256xf32>, vector<8x256xf32>, vector<8x8xf32> -> vector<8x8xf32>
    %27 = arith.addf %25, %26 : vector<8x8xf32>
    %c0_12 = arith.constant 0 : index
    %c0_13 = arith.constant 0 : index
    %28 = vector.load %arg5[%c0_12, %c0_13] : memref<8x8xf32, #tpu.memory_space<vmem>>, vector<8x8xf32>
    tpu.vector_store %arg5[%c0_12, %c0_13], %27 {strides = array<i32>} : memref<8x8xf32, #tpu.memory_space<vmem>>, vector<8x8xf32>,
    %c0_14 = arith.constant 0 : index
    %c0_15 = arith.constant 0 : index
    %29 = vector.load %arg6[%c0_14, %c0_15] : memref<8x8xf32, #tpu.memory_space<vmem>>, vector<8x8xf32>
    %cst_16 = arith.constant dense<0.000000e+00> : vector<8x8xf32>
    %30 = tpu.matmul %24, %13, %cst_16 {dimension_numbers = #tpu.dot_dimension_numbers<[1], [1], [0], [0], [0, 0, 1, 0], [], []>} : vector<8x256xf32>, vector<8x256xf32>, vector<8x8xf32> -> vector<8x8xf32>
    %31 = arith.addf %29, %30 : vector<8x8xf32>
    %c0_17 = arith.constant 0 : index
    %c0_18 = arith.constant 0 : index
    %32 = vector.load %arg6[%c0_17, %c0_18] : memref<8x8xf32, #tpu.memory_space<vmem>>, vector<8x8xf32>
    tpu.vector_store %arg6[%c0_17, %c0_18], %31 {strides = array<i32>} : memref<8x8xf32, #tpu.memory_space<vmem>>, vector<8x8xf32>,
    %c0_19 = arith.constant 0 : index
    %c0_20 = arith.constant 0 : index
    %33 = vector.load %arg7[%c0_19, %c0_20] : memref<8x8xf32, #tpu.memory_space<vmem>>, vector<8x8xf32>
    %cst_21 = arith.constant dense<0.000000e+00> : vector<8x8xf32>
    %34 = tpu.matmul %13, %13, %cst_21 {dimension_numbers = #tpu.dot_dimension_numbers<[1], [1], [0], [0], [0, 0, 1, 0], [], []>} : vector<8x256xf32>, vector<8x256xf32>, vector<8x8xf32> -> vector<8x8xf32>
    %35 = arith.addf %33, %34 : vector<8x8xf32>
    %c0_22 = arith.constant 0 : index
    %c0_23 = arith.constant 0 : index
    %36 = vector.load %arg7[%c0_22, %c0_23] : memref<8x8xf32, #tpu.memory_space<vmem>>, vector<8x8xf32>
    tpu.vector_store %arg7[%c0_22, %c0_23], %35 {strides = array<i32>} : memref<8x8xf32, #tpu.memory_space<vmem>>, vector<8x8xf32>,
    %c0_i32_24 = arith.constant 0 : i32
    %37 = arith.cmpi eq, %arg1, %c0_i32_24 : i32
    %38 = arith.extui %37 : i1 to i32
    %c0_i32_25 = arith.constant 0 : i32
    %39 = arith.cmpi ne, %38, %c0_i32_25 : i32
    scf.if %39 {
      %c0_26 = arith.constant 0 : index
      %c0_27 = arith.constant 0 : index
      %40 = vector.load %arg5[%c0_26, %c0_27] : memref<8x8xf32, #tpu.memory_space<vmem>>, vector<8x8xf32>
      %c0_28 = arith.constant 0 : index
      %c0_29 = arith.constant 0 : index
      %41 = vector.load %arg6[%c0_28, %c0_29] : memref<8x8xf32, #tpu.memory_space<vmem>>, vector<8x8xf32>
      %c0_30 = arith.constant 0 : index
      %c0_31 = arith.constant 0 : index
      %42 = vector.load %arg7[%c0_30, %c0_31] : memref<8x8xf32, #tpu.memory_space<vmem>>, vector<8x8xf32>
      %43 = arith.mulf %40, %40 : vector<8x8xf32>
      %cst_32 = arith.constant 2.000000e+00 : f32
      %44 = vector.broadcast %cst_32 : f32 to vector<8x8xf32>
      %45 = arith.mulf %44, %41 : vector<8x8xf32>
      %46 = arith.mulf %45, %41 : vector<8x8xf32>
      %47 = arith.subf %43, %46 : vector<8x8xf32>
      %48 = arith.mulf %42, %42 : vector<8x8xf32>
      %49 = arith.addf %47, %48 : vector<8x8xf32>
      %c0_33 = arith.constant 0 : index
      %c0_34 = arith.constant 0 : index
      %c0_35 = arith.constant 0 : index
      %50 = vector.load %arg4[%c0_33, %c0_34, %c0_35] : memref<1x8x8xf32, #tpu.memory_space<vmem>>, vector<1x8x8xf32>
      %51 = vector.shape_cast %50 : vector<1x8x8xf32> to vector<8x8xf32>
      %52 = vector.shape_cast %49 : vector<8x8xf32> to vector<1x8x8xf32>
      tpu.vector_store %arg4[%c0_33, %c0_34, %c0_35], %52 {strides = array<i32>} : memref<1x8x8xf32, #tpu.memory_space<vmem>>, vector<1x8x8xf32>,
    } else {
    }
    return
  }
  func.func @transform_0(%arg0: i32, %arg1: i32) -> (i32, i32, i32) {
    %c0_i32 = arith.constant 0 : i32
    %c0_i32_0 = arith.constant 0 : i32
    return %arg0, %c0_i32, %arg1 : i32, i32, i32
  }
  func.func @transform_1(%arg0: i32, %arg1: i32) -> (i32, i32, i32) {
    %c0_i32 = arith.constant 0 : i32
    %c0_i32_0 = arith.constant 0 : i32
    return %arg0, %c0_i32, %arg1 : i32, i32, i32
  }
  func.func @transform_2(%arg0: i32, %arg1: i32) -> (i32, i32, i32) {
    %c0_i32 = arith.constant 0 : i32
    %c0_i32_0 = arith.constant 0 : i32
    %c0_i32_1 = arith.constant 0 : i32
    return %arg0, %c0_i32, %c0_i32_0 : i32, i32, i32
  }
}

</mosaic_0001>

<bundles_post_ra>
// kernel: kd_loss.1
= control target key start
LH: loop header
LB: loop body
LE: loop exit
PB: predicated region body
PF: predicated region fallthrough
CT: control target
= control target key end

     0   :  { %s699_s9 = smov 0   ;;  %s701_s10 = smov 0   ;;  %s768_s0 = inlined_call_operand.vmem [shape: f32[2,8,256], index: 0, kind: input, shape index: {}]   ;;  %s769_s1 = inlined_call_operand.vmem [shape: f32[2,8,256], index: 1, kind: input, shape index: {}]   ;;  %s770_s2 = inlined_call_operand.vmem [shape: f32[2,8,8], index: 2, kind: output, shape index: {}]  }
   0x1   :  { %s703_s11 = smov 0  }
   0x2 LB: > { %s24_s12 = sadd.s32 1, %s677_s10  ;;  %p608_p0 = scmp.ge.s32.totalorder %s681_s11, 1  ;;  %s681_s11 = sphi %s703_s11, %s12_s11   ;;  %s677_s10 = sphi %s701_s10, %s772_s10   ;;  %s673_s9 = sphi %s699_s9, %s771_s9  }
   0x3   : > { %p26_p1 = scmp.ge.s32.totalorder %s24_s12, 2  ;;  %p148_p2 = scmp.lt.s32.totalorder %s681_s11, 3 }
   0x5   : > { %s774_s12 = smov (%p26_p1, %s24_s12), 0  ;;  %p149_p3 = pnand %p608_p0, %p148_p2 }
   0x6   : > { %p183_p4 = scmp.lt.s32.totalorder (!%p149_p3), %s673_s9, 1  ;;  %vm210_vm0 = vcmask (!%p149_p3), 64512   ;;  %v683_v0 = vmov (!%p149_p3), 0.0  }
   0x7   : > { %152 = sbr.rel (%p149_p3) target bundleno = 299 (0x12b), region = 28  ;;  %211 = vst.msk [vmem:[#allocation2] sm:$0xff] (!%p149_p3), %vm210_vm0, %v683_v0  ;;  %212 = vst.msk [vmem:[#allocation3] sm:$0xff] (!%p149_p3), %vm210_vm0, %v683_v0 }
   0x8   : > { %213 = vst.msk [vmem:[#allocation4] sm:$0xff] (!%p149_p3), %vm210_vm0, %v683_v0 }
   0xe   : > { %s776_s9 = smov (!%p183_p4, %s673_s9), 1 }
   0xf   : > { %s616_s13 = sshll.u32 %s776_s9, 4  ;;  %s613_s20 = sshll.u32 %s776_s9, 3 }
  0x10   : > { %s200_s16 = scalar_lea.vmem %s769_s1, %s616_s13  ;;  %s190_s19 = scalar_lea.vmem %s768_s0, %s616_s13 }
  0x11   : > { %v726_v1 = vld [vmem:[%s200_s16 + $0x8] sm:$0xff]  ;;  %v731_v2 = vld [vmem:[%s200_s16] sm:$0xff]  ;;  %s205_s23 = scalar_lea.vmem %s770_s2, %s613_s20 }
  0x12   : > { %v253_v3 = vmul.f32 %v726_v1, %v726_v1  ;;  %v735_v4 = vld [vmem:[%s190_s19 + $0x8] sm:$0xff]  ;;  %v252_v5 = vmul.f32 %v731_v2, %v731_v2  ;;  %v739_v6 = vld [vmem:[%s190_s19] sm:$0xff] }
  0x13   : > { %v217_v7 = vmul.f32 %v735_v4, %v735_v4  ;;  %v216_v8 = vmul.f32 %v739_v6, %v739_v6 }
  0x14   : > { %v260_v9 = vrot.slane %v253_v3, 4  ;;  %v254_v10 = vrot.slane %v252_v5, 4 }
  0x15   : > { %v224_v11 = vrot.slane %v217_v7, 4  ;;  %v218_v12 = vrot.slane %v216_v8, 4 }
  0x16   : > { %v261_v13 = vadd.f32 %v260_v9, %v253_v3  ;;  %v255_v14 = vadd.f32 %v254_v10, %v252_v5  ;;  %v360_v3 = vld [vmem:[#allocation3] sm:$0xff]  ;;  %v433_v10 = vld [vmem:[#allocation4] sm:$0xff] }
  0x17   : > { %v225_v15 = vadd.f32 %v224_v11, %v217_v7  ;;  %v219_v16 = vadd.f32 %v218_v12, %v216_v8 }
  0x18   : > { %v262_v17 = vrot.slane %v261_v13, 2  ;;  %v256_v18 = vrot.slane %v255_v14, 2 }
  0x19   : > { %v226_v19 = vrot.slane %v225_v15, 2  ;;  %v220_v20 = vrot.slane %v219_v16, 2 }
  0x1a   : > { %v263_v21 = vadd.f32 %v262_v17, %v261_v13  ;;  %v257_v22 = vadd.f32 %v256_v18, %v255_v14 }
  0x1b   : > { %v227_v23 = vadd.f32 %v226_v19, %v225_v15  ;;  %v221_v24 = vadd.f32 %v220_v20, %v219_v16 }
  0x1c   : > { %v264_v25 = vrot.slane %v263_v21, 1  ;;  %v258_v26 = vrot.slane %v257_v22, 1 }
  0x1d   : > { %v228_v27 = vrot.slane %v227_v23, 1  ;;  %v222_v28 = vrot.slane %v221_v24, 1 }
  0x1e   : > { %v265_v29 = vadd.f32 %v264_v25, %v263_v21  ;;  %v259_v30 = vadd.f32 %v258_v26, %v257_v22 }
  0x1f   : > { %v229_v31 = vadd.f32 %v228_v27, %v227_v23  ;;  %v223_v32 = vadd.f32 %v222_v28, %v221_v24 }
  0x20   : > { %643 = vrsqrt.f32 %v265_v29  ;;  %vm275_vm1 = vcmp.eq.f32.partialorder %v265_v29, inf  ;;  %vm277_vm2 = vcmp.eq.f32.partialorder %v265_v29, 0.0  ;;  %v278_v34 = vand.u32 2147483648, %v265_v29 }
  0x21   : > { %645 = vrsqrt.f32 %v229_v31  ;;  %vm239_vm3 = vcmp.eq.f32.partialorder %v229_v31, inf  ;;  %vm241_vm4 = vcmp.eq.f32.partialorder %v229_v31, 0.0  ;;  %v242_v37 = vand.u32 2147483648, %v229_v31 }
  0x22   : > { %647 = vrsqrt.f32 %v259_v30  ;;  %vm268_vm5 = vcmp.eq.f32.partialorder %v259_v30, inf  ;;  %vm270_vm6 = vcmp.eq.f32.partialorder %v259_v30, 0.0  ;;  %v271_v40 = vand.u32 2147483648, %v259_v30 }
  0x23   : > { %649 = vrsqrt.f32 %v223_v32  ;;  %vm232_vm7 = vcmp.eq.f32.partialorder %v223_v32, inf  ;;  %v235_v44 = vand.u32 2147483648, %v223_v32  ;;  %vm234_vm8 = vcmp.eq.f32.partialorder %v223_v32, 0.0 }
  0x2a   : > { %v644_v33 = vpop.eup %643 }
  0x2b   : > { %v646_v35 = vpop.eup %645  ;;  %v274_v36 = vmul.f32 %v644_v33, %v265_v29 }
  0x2c   : > { %v648_v38 = vpop.eup %647  ;;  %v238_v39 = vmul.f32 %v646_v35, %v229_v31 }
  0x2d   : > { %v650_v41 = vpop.eup %649  ;;  %v276_v42 = vsel %vm275_vm1, %v265_v29, %v274_v36  ;;  %v267_v43 = vmul.f32 %v648_v38, %v259_v30 }
  0x2e   : > { %v279_v45 = vsel %vm277_vm2, %v278_v34, %v276_v42  ;;  %v240_v46 = vsel %vm239_vm3, %v229_v31, %v238_v39  ;;  %v231_v47 = vmul.f32 %v650_v41, %v223_v32 }
  0x2f   : > { %v281_v48 = vadd.f32 1e-08, %v279_v45  ;;  %v243_v49 = vsel %vm241_vm4, %v242_v37, %v240_v46  ;;  %v269_v50 = vsel %vm268_vm5, %v259_v30, %v267_v43 }
  0x30   : > { %v245_v51 = vadd.f32 1e-08, %v243_v49  ;;  %v272_v52 = vsel %vm270_vm6, %v271_v40, %v269_v50  ;;  %v233_v53 = vsel %vm232_vm7, %v223_v32, %v231_v47 }
  0x31   : > { %651 = vrcp.f32 %v281_v48  ;;  %v280_v54 = vadd.f32 1e-08, %v272_v52  ;;  %v236_v55 = vsel %vm234_vm8, %v235_v44, %v233_v53 }
  0x32   : > { %653 = vrcp.f32 %v245_v51  ;;  %v244_v56 = vadd.f32 1e-08, %v236_v55 }
  0x33   : > { %655 = vrcp.f32 %v280_v54 }
  0x34   : > { %657 = vrcp.f32 %v244_v56 }
  0x3b   : > { %v652_v57 = vpop.eup %651 }
  0x3c   : > { %v654_v58 = vpop.eup %653  ;;  %v285_v59 = vmul.f32 %v652_v57, %v726_v1  ;;  %v286_v1 = vld [vmem:[#allocation2] sm:$0xff] }
  0x3d   : > { %v656_v60 = vpop.eup %655  ;;  %v249_v61 = vmul.f32 %v654_v58, %v735_v4 }
  0x3e   : > { %v658_v62 = vpop.eup %657  ;;  %287 = vmatprep.subr.mxu0 %v285_v59  ;;  %v284_v63 = vmul.f32 %v656_v60, %v731_v2  ;;  %351 = vmatprep.mubr.f32.mxu0 %v285_v59 }
  0x3f   : > { %361 = vmatprep.subr.mxu1 %v249_v61  ;;  %v248_v0 = vmul.f32 %v658_v62, %v739_v6  ;;  %425 = vmatprep.mubr.f32.mxu1 %v285_v59 }
  0x40   : > { %288 = vmatpush1.xpose.msra.mxu0 %v284_v63 }
  0x41   : > { %362 = vmatpush1.xpose.msra.mxu1 %v248_v0  ;;  %434 = vmatprep.subr.mxu0 %v249_v61 }
  0x43   : > { %352 = vmatmul.mubr.f32.vlgmr.msra.gmra.mrb[0].mxu0 %v284_v63 }
  0x44   : > { %426 = vmatmul.mubr.f32.vlgmr.msra.gmra.mrb[0].mxu1 %v284_v63  ;;  %435 = vmatpush1.xpose.msra.mxu0 %v248_v0 }
  0x45   : > { %498 = vmatprep.mubr.f32.mxu0 %v249_v61 }
  0x47   : > { %499 = vmatmul.mubr.f32.vlgmr.msra.gmra.mrb[2].mxu0 %v248_v0 }
 0x116   : > { %v353_v4 = vpop.f32.mrb[0].mxu0 }
 0x117   : > { %v357_v5 = vadd.f32 %v353_v4, %v286_v1  ;;  %v427_v7 = vpop.f32.mrb[0].mxu1  ;;  %v355_v2 = vpop.f32.mrb[1].mxu0 }
 0x118   : > { %v431_v8 = vadd.f32 %v427_v7, %v360_v3  ;;  %v429_v9 = vpop.f32.mrb[1].mxu1 }
 0x119   : > { %359 = vst.msk [vmem:[#allocation2] sm:$0xff] %vm210_vm0, %v357_v5 }
 0x11a   : > { %432 = vst.msk [vmem:[#allocation3] sm:$0xff] %vm210_vm0, %v431_v8  ;;  %v500_v6 = vpop.f32.mrb[2].mxu0 }
 0x11b   : > { %v504_v11 = vadd.f32 %v500_v6, %v433_v10  ;;  %v502_v12 = vpop.f32.mrb[3].mxu0 }
 0x11d   : > { %505 = vst.msk [vmem:[#allocation4] sm:$0xff] %vm210_vm0, %v504_v11 }
 0x120   : > { %v509_v13 = vld [vmem:[#allocation2] sm:$0xff] }
 0x121   : > { %v510_v14 = vld [vmem:[#allocation3] sm:$0xff]  ;;  %v512_v16 = vmul.f32 %v509_v13, %v509_v13 }
 0x122   : > { %v513_v15 = vmul.f32 2.0, %v510_v14 }
 0x124   : > { %v514_v17 = vmul.f32 %v513_v15, %v510_v14  ;;  %v511_v18 = vld [vmem:[#allocation4] sm:$0xff] }
 0x125   : > { %v516_v19 = vmul.f32 %v511_v18, %v511_v18 }
 0x126   : > { %v515_v20 = vsub.f32 %v512_v16, %v514_v17 }
 0x128   : > { %v517_v21 = vadd.f32 %v516_v19, %v515_v20 }
 0x12a   : > { %518 = vst.msk [vmem:[%s205_s23] sm:$0xff] %vm210_vm0, %v517_v21 }
 0x12b PF: > { %s12_s11 = sadd.s32 1, %s681_s11   ;;  %s771_s9 = smov %s677_s10 }
 0x12c   : > { %p9_p5 = scmp.ge.s32.totalorder %s12_s11, 4   ;;  %s772_s10 = smov %s774_s12 }
 0x12e   :  { %11 = sbr.rel (!%p9_p5) target bundleno = 2 (0x2), region = 69 }

</bundles_post_ra>
